<compile_context>
chip_gen: v5e
topology: v5e:2x2
jax: 0.10.0
libtpu: 0.0.40
codegen_flags: <defaults>
</compile_context>

<pallas_src>
import jax
import jax.numpy as jnp
from jax.experimental import pallas as pl
from jax.experimental.pallas import tpu as pltpu


_EPS = 1e-5
_LANE = 128


def _round_up(n, m):
    return ((n + m - 1) // m) * m


def _mlp_bn_kernel(x_ref, w1_ref, p1_ref, w2_ref, p2_ref, w3_ref, b3_ref, o_ref):
    # p*_ref rows: 0 = linear bias, 1 = BN gamma, 2 = BN beta (all f32).
    inv_b = 1.0 / x_ref.shape[0]

    x = x_ref[...]                                                   # (B, Kp) bf16

    # ---- fc1 + bias + ReLU (bf16 MXU, f32 accumulate) ----
    h1 = jnp.dot(x, w1_ref[...], preferred_element_type=jnp.float32)
    h1 = jnp.maximum(h1 + p1_ref[0:1, :], 0.0)                       # (B, H1p) f32

    # ---- BatchNorm1d #1 (training mode, biased variance), single pass ----
    mu1 = jnp.sum(h1, axis=0, keepdims=True) * inv_b
    var1 = jnp.sum(h1 * h1, axis=0, keepdims=True) * inv_b - mu1 * mu1
    h1 = (h1 - mu1) * jax.lax.rsqrt(var1 + _EPS) * p1_ref[1:2, :] + p1_ref[2:3, :]

    # ---- fc2 + bias + ReLU ----
    h2 = jnp.dot(h1.astype(w2_ref.dtype), w2_ref[...],
                 preferred_element_type=jnp.float32)
    h2 = jnp.maximum(h2 + p2_ref[0:1, :], 0.0)                       # (B, H2p) f32

    # ---- BatchNorm1d #2 ----
    mu2 = jnp.sum(h2, axis=0, keepdims=True) * inv_b
    var2 = jnp.sum(h2 * h2, axis=0, keepdims=True) * inv_b - mu2 * mu2
    h2 = (h2 - mu2) * jax.lax.rsqrt(var2 + _EPS) * p2_ref[1:2, :] + p2_ref[2:3, :]

    # ---- fc3: lane-dense (B, 128) padded logits ----
    o_ref[...] = (jnp.dot(h2.astype(w3_ref.dtype), w3_ref[...],
                          preferred_element_type=jnp.float32)
                  + b3_ref[...]).astype(o_ref.dtype)


def linear_model_forward(x_nchw, kernel_params):
    """x_nchw: (B, 1, 28, 28) float32 -> logits (B, 10) float32."""
    w1, p1, w2, p2, w3, b3 = kernel_params
    B = x_nchw.shape[0]
    K = x_nchw.shape[1] * x_nchw.shape[2] * x_nchw.shape[3]
    Kp = w1.shape[0]
    out_pad = w3.shape[1]                                            # 128

    # torch.flatten(x, 1), then lane-pad 784 -> Kp and cast to bf16 transport.
    x = x_nchw.reshape(B, K)
    x = jnp.pad(x, ((0, 0), (0, Kp - K))).astype(jnp.bfloat16)

    inputs = (x, w1, p1, w2, p2, w3, b3)
    # NOTE: bind ndim per-spec (late-binding closure bug fix).
    in_specs = [pl.BlockSpec(a.shape, lambda i, n=a.ndim: (0,) * n) for a in inputs]

    flops = 2 * B * (Kp * w1.shape[1] + w2.shape[0] * w2.shape[1]
                     + w3.shape[0] * out_pad)
    bytes_accessed = (sum(int(a.size) * a.dtype.itemsize for a in inputs)
                      + B * out_pad * 4)

    out = pl.pallas_call(
        _mlp_bn_kernel,
        out_shape=jax.ShapeDtypeStruct((B, out_pad), jnp.float32),
        grid=(1,),
        in_specs=in_specs,
        out_specs=pl.BlockSpec((B, out_pad), lambda i: (0, 0)),
        compiler_params=pltpu.CompilerParams(
            dimension_semantics=("arbitrary",)),
        cost_estimate=pl.CostEstimate(
            flops=flops,
            transcendentals=w1.shape[1] + w2.shape[1],
            bytes_accessed=bytes_accessed),
    )(*inputs)
    return out[:, :10]


def init_params(key, model_size):
    """f32 params matching PyTorch Linear default init; BN gamma=1, beta=0."""
    h1 = int(4.6 * model_size)
    h2 = int(2.3 * model_size)
    dims = [(784, h1), (h1, h2), (h2, 10)]
    keys = jax.random.split(key, 2 * len(dims))
    lin = []
    for i, (fi, fo) in enumerate(dims):
        bound = 1.0 / (fi ** 0.5)
        w = jax.random.uniform(keys[2 * i], (fi, fo), jnp.float32, -bound, bound)
        b = jax.random.uniform(keys[2 * i + 1], (fo,), jnp.float32, -bound, bound)
        lin.append((w, b))
    (w1, b1), (w2, b2), (w3, b3) = lin
    g1, be1 = jnp.ones((h1,), jnp.float32), jnp.zeros((h1,), jnp.float32)
    g2, be2 = jnp.ones((h2,), jnp.float32), jnp.zeros((h2,), jnp.float32)
    return (w1, b1, g1, be1, w2, b2, g2, be2, w3, b3)


def prepare_kernel_params(params):
    """Pad feature dims to 128-multiples, pack per-feature vectors, cast
    weights to bf16.  Done once at init, not per call."""
    (w1, b1, g1, be1, w2, b2, g2, be2, w3, b3) = params
    K, H1 = w1.shape
    H2, OUT = w3.shape[0], w3.shape[1]
    Kp, H1p = _round_up(K, _LANE), _round_up(H1, _LANE)
    H2p, OUTp = _round_up(H2, _LANE), _round_up(OUT, _LANE)

    def pad2(w, r, c):
        return jnp.pad(w, ((0, r - w.shape[0]), (0, c - w.shape[1])))

    def pad1(v, c, fill=0.0):
        return jnp.pad(v, (0, c - v.shape[0]), constant_values=fill)

    # Zero-padded rows/cols guarantee padded lanes stay exactly 0 through
    # ReLU and BN ((0-0)*rsqrt(0+eps)*gamma + 0 = 0), so no leakage downstream.
    w1p = pad2(w1, Kp, H1p).astype(jnp.bfloat16)
    w2p = pad2(w2, H1p, H2p).astype(jnp.bfloat16)
    w3p = pad2(w3, H2p, OUTp).astype(jnp.bfloat16)
    p1 = jnp.stack([pad1(b1, H1p), pad1(g1, H1p, 1.0), pad1(be1, H1p)])  # (3, H1p)
    p2 = jnp.stack([pad1(b2, H2p), pad1(g2, H2p, 1.0), pad1(be2, H2p)])  # (3, H2p)
    b3p = pad1(b3, OUTp).reshape(1, OUTp)                                # (1, 128)
    return (w1p, p1, w2p, p2, w3p, b3p)


def reference_forward(x_nchw, params):
    """Pure-JAX f32 reference matching the PyTorch forward (training-mode BN)."""
    (w1, b1, g1, be1, w2, b2, g2, be2, w3, b3) = params
    x = x_nchw.reshape(x_nchw.shape[0], -1)

    def bn(h, g, be):
        mu = jnp.mean(h, axis=0, keepdims=True)
        var = jnp.mean((h - mu) ** 2, axis=0, keepdims=True)
        return (h - mu) * jax.lax.rsqrt(var + _EPS) * g + be

    h = jnp.maximum(x @ w1 + b1, 0.0)
    h = bn(h, g1, be1)
    h = jnp.maximum(h @ w2 + b2, 0.0)
    h = bn(h, g2, be2)
    return h @ w3 + b3


if __name__ == "__main__":
    key = jax.random.PRNGKey(0)
    k_x, k_p = jax.random.split(key)

    model_size = 20                 # hidden dims 92 and 46 (padded to 128 in-kernel)
    batch = 8                       # BN statistics axis; kept exact (not padded)
    x = jax.random.normal(k_x, (batch, 1, 28, 28), jnp.float32)

    params = init_params(k_p, model_size)
    kparams = prepare_kernel_params(params)   # pad / pack / bf16-cast once

    out = linear_model_forward(x, kparams)
    out = jax.block_until_ready(out)
    assert out.shape == (batch, 10) and out.dtype == jnp.float32

    ref = reference_forward(x, params)
    max_err = float(jnp.max(jnp.abs(out - ref)))
    assert max_err < 0.25, f"numerical mismatch vs f32 reference: {max_err}"

    print("KERNEL_OK")
</pallas_src>

<mosaic_0001>
module attributes {stable_mosaic.version = 11 : i64} {
  func.func @_mlp_bn_kernel(%arg0: i32, %arg1: memref<8x896xbf16, #tpu.memory_space<vmem>>, %arg2: memref<896x128xbf16, #tpu.memory_space<vmem>>, %arg3: memref<3x128xf32, #tpu.memory_space<vmem>>, %arg4: memref<128x128xbf16, #tpu.memory_space<vmem>>, %arg5: memref<3x128xf32, #tpu.memory_space<vmem>>, %arg6: memref<128x128xbf16, #tpu.memory_space<vmem>>, %arg7: memref<1x128xf32, #tpu.memory_space<vmem>>, %arg8: memref<8x128xf32, #tpu.memory_space<vmem>>) attributes {dimension_semantics = [#tpu.dimension_semantics<arbitrary>], iteration_bounds = array<i64: 1>, scalar_prefetch = 0 : i64, scratch_operands = 0 : i64, tpu.core_type = #tpu.core_type<tc>, window_params = [{pipeline_mode = #tpu.pipeline_mode<synchronous>, transform_indices = @transform_0, window_bounds = array<i64: 8, 896>}, {pipeline_mode = #tpu.pipeline_mode<synchronous>, transform_indices = @transform_1, window_bounds = array<i64: 896, 128>}, {pipeline_mode = #tpu.pipeline_mode<synchronous>, transform_indices = @transform_2, window_bounds = array<i64: 3, 128>}, {pipeline_mode = #tpu.pipeline_mode<synchronous>, transform_indices = @transform_3, window_bounds = array<i64: 128, 128>}, {pipeline_mode = #tpu.pipeline_mode<synchronous>, transform_indices = @transform_4, window_bounds = array<i64: 3, 128>}, {pipeline_mode = #tpu.pipeline_mode<synchronous>, transform_indices = @transform_5, window_bounds = array<i64: 128, 128>}, {pipeline_mode = #tpu.pipeline_mode<synchronous>, transform_indices = @transform_6, window_bounds = array<i64: 1, 128>}, {pipeline_mode = #tpu.pipeline_mode<synchronous>, transform_indices = @transform_7, window_bounds = array<i64: 8, 128>}]} {
    %c0 = arith.constant 0 : index
    %c0_0 = arith.constant 0 : index
    %0 = vector.load %arg1[%c0, %c0_0] : memref<8x896xbf16, #tpu.memory_space<vmem>>, vector<8x896xbf16>
    %c0_1 = arith.constant 0 : index
    %c0_2 = arith.constant 0 : index
    %1 = vector.load %arg2[%c0_1, %c0_2] : memref<896x128xbf16, #tpu.memory_space<vmem>>, vector<896x128xbf16>
    %cst = arith.constant dense<0.000000e+00> : vector<8x128xf32>
    %2 = tpu.matmul %0, %1, %cst {dimension_numbers = #tpu.dot_dimension_numbers<[1], [0], [0], [1], [0, 0, 1, 1], [], []>} : vector<8x896xbf16>, vector<896x128xbf16>, vector<8x128xf32> -> vector<8x128xf32>
    %c0_3 = arith.constant 0 : index
    %c0_4 = arith.constant 0 : index
    %3 = vector.load %arg3[%c0_3, %c0_4] : memref<3x128xf32, #tpu.memory_space<vmem>>, vector<1x128xf32>
    %4 = vector.broadcast %3 : vector<1x128xf32> to vector<8x128xf32>
    %5 = arith.addf %2, %4 : vector<8x128xf32>
    %cst_5 = arith.constant 0.000000e+00 : f32
    %6 = vector.broadcast %cst_5 : f32 to vector<8x128xf32>
    %7 = arith.maximumf %5, %6 : vector<8x128xf32>
    %cst_6 = arith.constant dense<0.000000e+00> : vector<128xf32>
    %8 = vector.multi_reduction <add>, %7, %cst_6 [0] : vector<8x128xf32> to vector<128xf32>
    %9 = vector.shape_cast %8 : vector<128xf32> to vector<1x128xf32>
    %cst_7 = arith.constant 1.250000e-01 : f32
    %10 = vector.broadcast %cst_7 : f32 to vector<1x128xf32>
    %11 = arith.mulf %9, %10 : vector<1x128xf32>
    %12 = arith.mulf %7, %7 : vector<8x128xf32>
    %cst_8 = arith.constant dense<0.000000e+00> : vector<128xf32>
    %13 = vector.multi_reduction <add>, %12, %cst_8 [0] : vector<8x128xf32> to vector<128xf32>
    %14 = vector.shape_cast %13 : vector<128xf32> to vector<1x128xf32>
    %cst_9 = arith.constant 1.250000e-01 : f32
    %15 = vector.broadcast %cst_9 : f32 to vector<1x128xf32>
    %16 = arith.mulf %14, %15 : vector<1x128xf32>
    %17 = arith.mulf %11, %11 : vector<1x128xf32>
    %18 = arith.subf %16, %17 : vector<1x128xf32>
    %19 = vector.broadcast %11 : vector<1x128xf32> to vector<8x128xf32>
    %20 = arith.subf %7, %19 : vector<8x128xf32>
    %cst_10 = arith.constant 9.99999974E-6 : f32
    %21 = vector.broadcast %cst_10 : f32 to vector<1x128xf32>
    %22 = arith.addf %18, %21 : vector<1x128xf32>
    %23 = math.rsqrt %22 : vector<1x128xf32>
    %24 = vector.broadcast %23 : vector<1x128xf32> to vector<8x128xf32>
    %25 = arith.mulf %20, %24 : vector<8x128xf32>
    %c1 = arith.constant 1 : index
    %c0_11 = arith.constant 0 : index
    %26 = vector.load %arg3[%c1, %c0_11] : memref<3x128xf32, #tpu.memory_space<vmem>>, vector<1x128xf32>
    %27 = vector.broadcast %26 : vector<1x128xf32> to vector<8x128xf32>
    %28 = arith.mulf %25, %27 : vector<8x128xf32>
    %c2 = arith.constant 2 : index
    %c0_12 = arith.constant 0 : index
    %29 = vector.load %arg3[%c2, %c0_12] : memref<3x128xf32, #tpu.memory_space<vmem>>, vector<1x128xf32>
    %30 = vector.broadcast %29 : vector<1x128xf32> to vector<8x128xf32>
    %31 = arith.addf %28, %30 : vector<8x128xf32>
    %32 = arith.truncf %31 : vector<8x128xf32> to vector<8x128xbf16>
    %c0_13 = arith.constant 0 : index
    %c0_14 = arith.constant 0 : index
    %33 = vector.load %arg4[%c0_13, %c0_14] : memref<128x128xbf16, #tpu.memory_space<vmem>>, vector<128x128xbf16>
    %cst_15 = arith.constant dense<0.000000e+00> : vector<8x128xf32>
    %34 = tpu.matmul %32, %33, %cst_15 {dimension_numbers = #tpu.dot_dimension_numbers<[1], [0], [0], [1], [0, 0, 1, 1], [], []>} : vector<8x128xbf16>, vector<128x128xbf16>, vector<8x128xf32> -> vector<8x128xf32>
    %c0_16 = arith.constant 0 : index
    %c0_17 = arith.constant 0 : index
    %35 = vector.load %arg5[%c0_16, %c0_17] : memref<3x128xf32, #tpu.memory_space<vmem>>, vector<1x128xf32>
    %36 = vector.broadcast %35 : vector<1x128xf32> to vector<8x128xf32>
    %37 = arith.addf %34, %36 : vector<8x128xf32>
    %cst_18 = arith.constant 0.000000e+00 : f32
    %38 = vector.broadcast %cst_18 : f32 to vector<8x128xf32>
    %39 = arith.maximumf %37, %38 : vector<8x128xf32>
    %cst_19 = arith.constant dense<0.000000e+00> : vector<128xf32>
    %40 = vector.multi_reduction <add>, %39, %cst_19 [0] : vector<8x128xf32> to vector<128xf32>
    %41 = vector.shape_cast %40 : vector<128xf32> to vector<1x128xf32>
    %cst_20 = arith.constant 1.250000e-01 : f32
    %42 = vector.broadcast %cst_20 : f32 to vector<1x128xf32>
    %43 = arith.mulf %41, %42 : vector<1x128xf32>
    %44 = arith.mulf %39, %39 : vector<8x128xf32>
    %cst_21 = arith.constant dense<0.000000e+00> : vector<128xf32>
    %45 = vector.multi_reduction <add>, %44, %cst_21 [0] : vector<8x128xf32> to vector<128xf32>
    %46 = vector.shape_cast %45 : vector<128xf32> to vector<1x128xf32>
    %cst_22 = arith.constant 1.250000e-01 : f32
    %47 = vector.broadcast %cst_22 : f32 to vector<1x128xf32>
    %48 = arith.mulf %46, %47 : vector<1x128xf32>
    %49 = arith.mulf %43, %43 : vector<1x128xf32>
    %50 = arith.subf %48, %49 : vector<1x128xf32>
    %51 = vector.broadcast %43 : vector<1x128xf32> to vector<8x128xf32>
    %52 = arith.subf %39, %51 : vector<8x128xf32>
    %cst_23 = arith.constant 9.99999974E-6 : f32
    %53 = vector.broadcast %cst_23 : f32 to vector<1x128xf32>
    %54 = arith.addf %50, %53 : vector<1x128xf32>
    %55 = math.rsqrt %54 : vector<1x128xf32>
    %56 = vector.broadcast %55 : vector<1x128xf32> to vector<8x128xf32>
    %57 = arith.mulf %52, %56 : vector<8x128xf32>
    %c1_24 = arith.constant 1 : index
    %c0_25 = arith.constant 0 : index
    %58 = vector.load %arg5[%c1_24, %c0_25] : memref<3x128xf32, #tpu.memory_space<vmem>>, vector<1x128xf32>
    %59 = vector.broadcast %58 : vector<1x128xf32> to vector<8x128xf32>
    %60 = arith.mulf %57, %59 : vector<8x128xf32>
    %c2_26 = arith.constant 2 : index
    %c0_27 = arith.constant 0 : index
    %61 = vector.load %arg5[%c2_26, %c0_27] : memref<3x128xf32, #tpu.memory_space<vmem>>, vector<1x128xf32>
    %62 = vector.broadcast %61 : vector<1x128xf32> to vector<8x128xf32>
    %63 = arith.addf %60, %62 : vector<8x128xf32>
    %64 = arith.truncf %63 : vector<8x128xf32> to vector<8x128xbf16>
    %c0_28 = arith.constant 0 : index
    %c0_29 = arith.constant 0 : index
    %65 = vector.load %arg6[%c0_28, %c0_29] : memref<128x128xbf16, #tpu.memory_space<vmem>>, vector<128x128xbf16>
    %cst_30 = arith.constant dense<0.000000e+00> : vector<8x128xf32>
    %66 = tpu.matmul %64, %65, %cst_30 {dimension_numbers = #tpu.dot_dimension_numbers<[1], [0], [0], [1], [0, 0, 1, 1], [], []>} : vector<8x128xbf16>, vector<128x128xbf16>, vector<8x128xf32> -> vector<8x128xf32>
    %c0_31 = arith.constant 0 : index
    %c0_32 = arith.constant 0 : index
    %67 = vector.load %arg7[%c0_31, %c0_32] : memref<1x128xf32, #tpu.memory_space<vmem>>, vector<1x128xf32>
    %68 = vector.broadcast %67 : vector<1x128xf32> to vector<8x128xf32>
    %69 = arith.addf %66, %68 : vector<8x128xf32>
    %c0_33 = arith.constant 0 : index
    %c0_34 = arith.constant 0 : index
    %70 = vector.load %arg8[%c0_33, %c0_34] : memref<8x128xf32, #tpu.memory_space<vmem>>, vector<8x128xf32>
    tpu.vector_store %arg8[%c0_33, %c0_34], %69 {strides = array<i32>} : memref<8x128xf32, #tpu.memory_space<vmem>>, vector<8x128xf32>,
    return
  }
  func.func @transform_0(%arg0: i32) -> (i32, i32) {
    %c0_i32 = arith.constant 0 : i32
    %c0_i32_0 = arith.constant 0 : i32
    %c0_i32_1 = arith.constant 0 : i32
    return %c0_i32, %c0_i32_0 : i32, i32
  }
  func.func @transform_1(%arg0: i32) -> (i32, i32) {
    %c0_i32 = arith.constant 0 : i32
    %c0_i32_0 = arith.constant 0 : i32
    %c0_i32_1 = arith.constant 0 : i32
    return %c0_i32, %c0_i32_0 : i32, i32
  }
  func.func @transform_2(%arg0: i32) -> (i32, i32) {
    %c0_i32 = arith.constant 0 : i32
    %c0_i32_0 = arith.constant 0 : i32
    %c0_i32_1 = arith.constant 0 : i32
    return %c0_i32, %c0_i32_0 : i32, i32
  }
  func.func @transform_3(%arg0: i32) -> (i32, i32) {
    %c0_i32 = arith.constant 0 : i32
    %c0_i32_0 = arith.constant 0 : i32
    %c0_i32_1 = arith.constant 0 : i32
    return %c0_i32, %c0_i32_0 : i32, i32
  }
  func.func @transform_4(%arg0: i32) -> (i32, i32) {
    %c0_i32 = arith.constant 0 : i32
    %c0_i32_0 = arith.constant 0 : i32
    %c0_i32_1 = arith.constant 0 : i32
    return %c0_i32, %c0_i32_0 : i32, i32
  }
  func.func @transform_5(%arg0: i32) -> (i32, i32) {
    %c0_i32 = arith.constant 0 : i32
    %c0_i32_0 = arith.constant 0 : i32
    %c0_i32_1 = arith.constant 0 : i32
    return %c0_i32, %c0_i32_0 : i32, i32
  }
  func.func @transform_6(%arg0: i32) -> (i32, i32) {
    %c0_i32 = arith.constant 0 : i32
    %c0_i32_0 = arith.constant 0 : i32
    %c0_i32_1 = arith.constant 0 : i32
    return %c0_i32, %c0_i32_0 : i32, i32
  }
  func.func @transform_7(%arg0: i32) -> (i32, i32) {
    %c0_i32 = arith.constant 0 : i32
    %c0_i32_0 = arith.constant 0 : i32
    %c0_i32_1 = arith.constant 0 : i32
    return %c0_i32, %c0_i32_0 : i32, i32
  }
}

</mosaic_0001>

<bundles_post_ra>
// kernel: tpu_custom_call.1
= control target key start
LH: loop header
LB: loop body
LE: loop exit
PB: predicated region body
PF: predicated region fallthrough
CT: control target
= control target key end

     0   :  { %12 = vsyncpa [#allocation3], 0  ;;  %s1582_s0 = inlined_call_operand.hbm [shape: bf16[8,896], index: 0, kind: input, shape index: {}]   ;;  %s1583_s1 = inlined_call_operand.hbm [shape: bf16[896,128], index: 1, kind: input, shape index: {}]   ;;  %s1584_s2 = inlined_call_operand.hbm [shape: f32[3,128], index: 2, kind: input, shape index: {}]   ;;  %s1585_s3 = inlined_call_operand.hbm [shape: bf16[128,128], index: 3, kind: input, shape index: {}]   ;;  %s1586_s4 = inlined_call_operand.hbm [shape: f32[3,128], index: 4, kind: input, shape index: {}]   ;;  %s1587_s5 = inlined_call_operand.hbm [shape: bf16[128,128], index: 5, kind: input, shape index: {}]   ;;  %s1588_s6 = inlined_call_operand.vmem [shape: f32[1,128], index: 6, kind: input, shape index: {}]   ;;  %s1589_s7 = inlined_call_operand.hbm [shape: f32[8,128], index: 7, kind: output, shape index: {}]  }
   0x1   :  { %13 = vsyncpa [#allocation6], 0 }
   0x2   :  { %14 = vsyncpa [#allocation9], 0 }
   0x3   :  { %15 = vsyncpa [#allocation12], 0  ;;  %s32_s26 = sshll.u32 %s1583_s1, 4  ;;  %s33_s26 = int_to_ptr.hbm [resolvable:$true] %s32_s26 }
   0x4   :  { %16 = vsyncpa [#allocation4], 0  ;;  %s1500_s27 = smov [#allocation5]   ;;  %s56_s8 = sshll.u32 %s1585_s3, 4  ;;  %s57_s8 = int_to_ptr.hbm [resolvable:$true] %s56_s8 }
   0x5   :  { %s34_s28 = sshll.u32 %s1500_s27, 4  ;;  %s1501_s9 = smov 64   ;;  %s35_s28 = int_to_ptr.vmem [resolvable:$true] %s34_s28 }
   0x6   :  { %s1502_s10 = smov 4   ;;  %s1503_s11 = smov [#allocation8]  }
   0x7   :  { %40 = dma.hbm_to_vmem [thread:$0]  %s33_s26, 7168, %s35_s28, [#allocation6], %s1501_s9, %s1501_s9, %s1502_s10  }
   0x8   :  { %s58_s12 = sshll.u32 %s1503_s11, 4  ;;  %s22_s14 = sshll.u32 %s1582_s0, 4  ;;  %s59_s12 = int_to_ptr.vmem [resolvable:$true] %s58_s12  ;;  %s23_s14 = int_to_ptr.hbm [resolvable:$true] %s22_s14 }
   0x9   :  { %64 = dma.hbm_to_vmem [thread:$0]  %s57_s8, 1024, %s59_s12, [#allocation9], %s1501_s9, %s1501_s9, %s1502_s10  }
   0xa   :  { %s46_s16 = sshll.u32 %s1584_s2, 4  ;;  %s1504_s17 = smov [#allocation2]   ;;  %s47_s16 = int_to_ptr.hbm [resolvable:$true] %s46_s16 }
   0xb   :  { %s24_s18 = sshll.u32 %s1504_s17, 4  ;;  %s1505_s19 = smov [#allocation7]   ;;  %s25_s18 = int_to_ptr.vmem [resolvable:$true] %s24_s18 }
   0xc   :  { %27 = dma.hbm_to_vmem [thread:$0]  %s23_s14, 448, %s25_s18, [#allocation3]  }
   0xd   :  { %s48_s20 = sshll.u32 %s1505_s19, 4  ;;  %s70_s0 = sshll.u32 %s1586_s4, 4  ;;  %s49_s20 = int_to_ptr.vmem [resolvable:$true] %s48_s20  ;;  %s71_s0 = int_to_ptr.hbm [resolvable:$true] %s70_s0 }
   0xe   :  { %51 = dma.hbm_to_vmem [thread:$0]  %s47_s16, 64, %s49_s20, [#allocation6]  }
   0xf   :  { %s80_s25 = sshll.u32 %s1587_s5, 4  ;;  %s1506_s26 = smov [#allocation10]   ;;  %s81_s25 = int_to_ptr.hbm [resolvable:$true] %s80_s25 }
  0x10   :  { %s72_s2 = sshll.u32 %s1506_s26, 4  ;;  %s1507_s27 = smov [#allocation11]   ;;  %s73_s2 = int_to_ptr.vmem [resolvable:$true] %s72_s2 }
  0x11   :  { %75 = dma.hbm_to_vmem [thread:$0]  %s71_s0, 64, %s73_s2, [#allocation9]  }
  0x12   :  { %s82_s28 = sshll.u32 %s1507_s27, 4  ;;  %s83_s28 = int_to_ptr.vmem [resolvable:$true] %s82_s28 }
  0x13   :  { %88 = dma.hbm_to_vmem [thread:$0]  %s81_s25, 1024, %s83_s28, [#allocation12], %s1501_s9, %s1501_s9, %s1502_s10  }
  0x14   :  { %1490 = dma.done.wait [#allocation3], 448  }
  0x15   :  { %1491 = vsyncadd [#allocation3], 4294966848 }
  0x16   :  { %1492 = dma.done.wait [#allocation6], 7232  }
  0x17   :  { %1493 = vsyncadd [#allocation6], 4294960064 }
  0x18   :  { %1494 = dma.done.wait [#allocation9], 1088  }
  0x19   :  { %1495 = vsyncadd [#allocation9], 4294966208 }
  0x1a   :  { %1496 = dma.done.wait [#allocation12], 1024  }
  0x1b   :  { %1497 = vsyncadd [#allocation12], 4294966272  ;;  %v1237_v0 = vld [vmem:[#allocation5 + $0x38] sm:$0xff]  ;;  %v1236_v3 = vld [vmem:[#allocation5 + $0x30] sm:$0xff]  ;;  %s1508_s29 = smov [#allocation13]   ;;  %s929_s10 = sshll.u32 %s1589_s7, 4  ;;  %s930_s10 = int_to_ptr.hbm [resolvable:$true] %s929_s10 }
  0x1c   :  { %v1245_v1 = vld [vmem:[#allocation5 + $0x78] sm:$0xff]  ;;  %594 = vmatpush.bf16.msra.mxu0 %v1237_v0  ;;  %v1244_v4 = vld [vmem:[#allocation5 + $0x70] sm:$0xff]  ;;  %v1235_v7 = vld [vmem:[#allocation5 + $0x28] sm:$0xff]  ;;  %s927_s30 = sshll.u32 %s1508_s29, 4  ;;  %s928_s30 = int_to_ptr.vmem [resolvable:$true] %s927_s30 }
  0x1d   :  { %v1253_v2 = vld [vmem:[#allocation5 + $0xb8] sm:$0xff]  ;;  %607 = vmatpush.bf16.msra.mxu1 %v1245_v1  ;;  %v1252_v5 = vld [vmem:[#allocation5 + $0xb0] sm:$0xff]  ;;  %v1243_v8 = vld [vmem:[#allocation5 + $0x68] sm:$0xff] }
  0x1e   :  { %620 = vmatpush.bf16.msra.mxu2 %v1253_v2  ;;  %v1261_v6 = vld [vmem:[#allocation5 + $0xf8] sm:$0xff]  ;;  %v1251_v9 = vld [vmem:[#allocation5 + $0xa8] sm:$0xff]  ;;  %v1260_v10 = vld [vmem:[#allocation5 + $0xf0] sm:$0xff] }
  0x1f   :  { %633 = vmatpush.bf16.msra.mxu3 %v1261_v6  ;;  %v1234_v11 = vld [vmem:[#allocation5 + $0x20] sm:$0xff]  ;;  %v1259_v14 = vld [vmem:[#allocation5 + $0xe8] sm:$0xff]  ;;  %v1233_v15 = vld [vmem:[#allocation5 + $0x18] sm:$0xff] }
  0x20   :  { %595 = vmatpush.bf16.msra.mxu0 %v1236_v3  ;;  %v1242_v12 = vld [vmem:[#allocation5 + $0x60] sm:$0xff]  ;;  %v1241_v16 = vld [vmem:[#allocation5 + $0x58] sm:$0xff]  ;;  %v1232_v19 = vld [vmem:[#allocation5 + $0x10] sm:$0xff] }
  0x21   :  { %608 = vmatpush.bf16.msra.mxu1 %v1244_v4  ;;  %v1250_v13 = vld [vmem:[#allocation5 + $0xa0] sm:$0xff]  ;;  %v1249_v17 = vld [vmem:[#allocation5 + $0x98] sm:$0xff]  ;;  %v1240_v20 = vld [vmem:[#allocation5 + $0x50] sm:$0xff] }
  0x22   :  { %621 = vmatpush.bf16.msra.mxu2 %v1252_v5  ;;  %v1258_v18 = vld [vmem:[#allocation5 + $0xe0] sm:$0xff]  ;;  %v1248_v21 = vld [vmem:[#allocation5 + $0x90] sm:$0xff]  ;;  %v1257_v22 = vld [vmem:[#allocation5 + $0xd8] sm:$0xff] }
  0x23   :  { %634 = vmatpush.bf16.msra.mxu3 %v1260_v10  ;;  %v1231_v23 = vld [vmem:[#allocation5 + $0x8] sm:$0xff]  ;;  %v1256_v27 = vld [vmem:[#allocation5 + $0xd0] sm:$0xff]  ;;  %v1230_v30 = vld [vmem:[#allocation5] sm:$0xff] }
  0x24   :  { %596 = vmatpush.bf16.msra.mxu0 %v1235_v7  ;;  %v1239_v24 = vld [vmem:[#allocation5 + $0x48] sm:$0xff]  ;;  %v1238_v31 = vld [vmem:[#allocation5 + $0x40] sm:$0xff]  ;;  %v1269_v35 = vld [vmem:[#allocation5 + $0x138] sm:$0xff] }
  0x25   :  { %609 = vmatpush.bf16.msra.mxu1 %v1243_v8  ;;  %v115_v25 = vld [vmem:[#allocation2] sm:$0xff]  ;;  %v116_v28 = vld [vmem:[#allocation2 + $0x8] sm:$0xff]  ;;  %v1277_v36 = vld [vmem:[#allocation5 + $0x178] sm:$0xff] }
  0x26   :  { %622 = vmatpush.bf16.msra.mxu2 %v1251_v9  ;;  %v1247_v26 = vld [vmem:[#allocation5 + $0x88] sm:$0xff]  ;;  %v237_v29 = vunpack.c.l.b16 %v115_v25  ;;  %v239_v32 = vunpack.c.l.b16 %v116_v28  ;;  %v238_v33 = vunpack.c.h.b16 %v115_v25  ;;  %v1246_v34 = vld [vmem:[#allocation5 + $0x80] sm:$0xff]  ;;  %v1285_v37 = vld [vmem:[#allocation5 + $0x1b8] sm:$0xff]  ;;  %v240_v46 = vunpack.c.h.b16 %v116_v28 }
  0x27   :  { %635 = vmatpush.bf16.msra.mxu3 %v1259_v14  ;;  %v1255_v39 = vld [vmem:[#allocation5 + $0xc8] sm:$0xff]  ;;  %v1268_v42 = vld [vmem:[#allocation5 + $0x130] sm:$0xff]  ;;  %v1254_v45 = vld [vmem:[#allocation5 + $0xc0] sm:$0xff] }
  0x28   :  { %597 = vmatpush.bf16.msra.mxu0 %v1234_v11  ;;  %v244_v38 = vpack.c.b16 %v237_v29, %v237_v29  ;;  %v246_v40 = vpack.c.b16 %v239_v32, %v239_v32  ;;  %v245_v41 = vpack.c.b16 %v238_v33, %v238_v33  ;;  %v1276_v43 = vld [vmem:[#allocation5 + $0x170] sm:$0xff]  ;;  %v1267_v47 = vld [vmem:[#allocation5 + $0x128] sm:$0xff]  ;;  %v247_v50 = vpack.c.b16 %v240_v46, %v240_v46  ;;  %v1266_v51 = vld [vmem:[#allocation5 + $0x120] sm:$0xff] }
  0x29   :  { %610 = vmatpush.bf16.msra.mxu1 %v1242_v12  ;;  %v1284_v44 = vld [vmem:[#allocation5 + $0x1b0] sm:$0xff]  ;;  %v1275_v48 = vld [vmem:[#allocation5 + $0x168] sm:$0xff]  ;;  %v1274_v52 = vld [vmem:[#allocation5 + $0x160] sm:$0xff] }
  0x2a   :  { %623 = vmatpush.bf16.msra.mxu2 %v1250_v13  ;;  %v1283_v49 = vld [vmem:[#allocation5 + $0x1a8] sm:$0xff]  ;;  %v1282_v53 = vld [vmem:[#allocation5 + $0x1a0] sm:$0xff]  ;;  %v1265_v54 = vld [vmem:[#allocation5 + $0x118] sm:$0xff] }
  0x2b   :  { %636 = vmatpush.bf16.msra.mxu3 %v1258_v18  ;;  %v1273_v55 = vld [vmem:[#allocation5 + $0x158] sm:$0xff]  ;;  %v1264_v57 = vld [vmem:[#allocation5 + $0x110] sm:$0xff]  ;;  %v1263_v60 = vld [vmem:[#allocation5 + $0x108] sm:$0xff] }
  0x2c   :  { %598 = vmatpush.bf16.msra.mxu0 %v1233_v15  ;;  %v1281_v56 = vld [vmem:[#allocation5 + $0x198] sm:$0xff]  ;;  %v1272_v58 = vld [vmem:[#allocation5 + $0x150] sm:$0xff]  ;;  %v1271_v62 = vld [vmem:[#allocation5 + $0x148] sm:$0xff] }
  0x2d   :  { %611 = vmatpush.bf16.msra.mxu1 %v1241_v16  ;;  %v1280_v59 = vld [vmem:[#allocation5 + $0x190] sm:$0xff]  ;;  %v1279_v63 = vld [vmem:[#allocation5 + $0x188] sm:$0xff]  ;;  %v118_v0 = vld [vmem:[#allocation2 + $0x18] sm:$0xf] }
  0x2e   :  { %624 = vmatpush.bf16.msra.mxu2 %v1249_v17  ;;  %v117_v61 = vld [vmem:[#allocation2 + $0x10] sm:$0xff]  ;;  %v1262_v2 = vld [vmem:[#allocation5 + $0x100] sm:$0xff]  ;;  %v243_v4 = vunpack.c.l.b16 %v118_v0 }
  0x2f   :  { %637 = vmatpush.bf16.msra.mxu3 %v1257_v22  ;;  %v241_v1 = vunpack.c.l.b16 %v117_v61  ;;  %v242_v3 = vunpack.c.h.b16 %v117_v61  ;;  %v1270_v5 = vld [vmem:[#allocation5 + $0x140] sm:$0xff] }
  0x30   :  { %599 = vmatpush.bf16.msra.mxu0 %v1232_v19  ;;  %v1278_v6 = vld [vmem:[#allocation5 + $0x180] sm:$0xff]  ;;  %v250_v9 = vpack.c.b16 %v243_v4, %v243_v4 }
  0x31   :  { %612 = vmatpush.bf16.msra.mxu1 %v1240_v20  ;;  %v248_v7 = vpack.c.b16 %v241_v1, %v241_v1  ;;  %v249_v8 = vpack.c.b16 %v242_v3, %v242_v3  ;;  %v1311_v15 = vld [vmem:[#allocation7] ss:$0 sm:$0xff]  ;;  %v1290_v29 = vld [vmem:[#allocation8 + $0x20] sm:$0xff] }
  0x32   :  { %625 = vmatpush.bf16.msra.mxu2 %v1248_v21  ;;  %v1293_v21 = vld [vmem:[#allocation8 + $0x38] sm:$0xff] }
  0x33   :  { %638 = vmatpush.bf16.msra.mxu3 %v1256_v27  ;;  %v1289_v32 = vld [vmem:[#allocation8 + $0x18] sm:$0xff] }
  0x34   :  { %600 = vmatpush.bf16.msra.mxu0 %v1231_v23  ;;  %v1292_v23 = vld [vmem:[#allocation8 + $0x30] sm:$0xff] }
  0x35   :  { %613 = vmatpush.bf16.msra.mxu1 %v1239_v24 }
  0x36   :  { %626 = vmatpush.bf16.msra.mxu2 %v1247_v26  ;;  %v1291_v26 = vld [vmem:[#allocation8 + $0x28] sm:$0xff] }
  0x37   :  { %639 = vmatpush.bf16.msra.mxu3 %v1255_v39 }
  0x38   :  { %601 = vmatpush.bf16.msra.mxu0 %v1230_v30 }
  0x39   :  { %614 = vmatpush.bf16.msra.mxu1 %v1238_v31 }
  0x3a   :  { %627 = vmatpush.bf16.msra.mxu2 %v1246_v34 }
  0x3b   :  { %602 = vmatmul.bf16.vlgmr.msra.gmra.mxu0 %v244_v38  ;;  %640 = vmatpush.bf16.msra.mxu3 %v1254_v45 }
  0x3c   :  { %646 = vmatpush.bf16.msrb.mxu0 %v1269_v35  ;;  %615 = vmatmul.bf16.vlgmr.msra.gmra.mxu1 %v245_v41 }
  0x3d   :  { %659 = vmatpush.bf16.msrb.mxu1 %v1277_v36  ;;  %628 = vmatmul.bf16.vlgmr.msra.gmra.mxu2 %v246_v40 }
  0x3e   :  { %672 = vmatpush.bf16.msrb.mxu2 %v1285_v37  ;;  %641 = vmatmul.bf16.vlgmr.msra.gmra.mxu3 %v247_v50  ;;  %v1288_v37 = vld [vmem:[#allocation8 + $0x10] sm:$0xff] }
  0x3f   :  { %789 = vmatpush.bf16.msrb.mxu3 %v1293_v21 }
  0x40   :  { %647 = vmatpush.bf16.msrb.mxu0 %v1268_v42 }
  0x41   :  { %660 = vmatpush.bf16.msrb.mxu1 %v1276_v43  ;;  %v1287_v43 = vld [vmem:[#allocation8 + $0x8] sm:$0xff] }
  0x42   :  { %673 = vmatpush.bf16.msrb.mxu2 %v1284_v44 }
  0x43   :  { %790 = vmatpush.bf16.msrb.mxu3 %v1292_v23 }
  0x44   :  { %648 = vmatpush.bf16.msrb.mxu0 %v1267_v47 }
  0x45   :  { %661 = vmatpush.bf16.msrb.mxu1 %v1275_v48  ;;  %v1286_v48 = vld [vmem:[#allocation8] sm:$0xff] }
  0x46   :  { %674 = vmatpush.bf16.msrb.mxu2 %v1283_v49 }
  0x47   :  { %791 = vmatpush.bf16.msrb.mxu3 %v1291_v26  ;;  %v1295_v26 = vld [vmem:[#allocation11 + $0x8] sm:$0xff] }
  0x48   :  { %649 = vmatpush.bf16.msrb.mxu0 %v1266_v51 }
  0x49   :  { %662 = vmatpush.bf16.msrb.mxu1 %v1274_v52 }
  0x4a   :  { %675 = vmatpush.bf16.msrb.mxu2 %v1282_v53 }
  0x4b   :  { %792 = vmatpush.bf16.msrb.mxu3 %v1290_v29  ;;  %v1294_v29 = vld [vmem:[#allocation11] sm:$0xff] }
  0x4c   :  { %650 = vmatpush.bf16.msrb.mxu0 %v1265_v54 }
  0x4d   :  { %663 = vmatpush.bf16.msrb.mxu1 %v1273_v55 }
  0x4e   :  { %676 = vmatpush.bf16.msrb.mxu2 %v1281_v56 }
  0x4f   :  { %793 = vmatpush.bf16.msrb.mxu3 %v1289_v32 }
  0x50   :  { %651 = vmatpush.bf16.msrb.mxu0 %v1264_v57 }
  0x51   :  { %664 = vmatpush.bf16.msrb.mxu1 %v1272_v58 }
  0x52   :  { %677 = vmatpush.bf16.msrb.mxu2 %v1280_v59 }
  0x53   :  { %794 = vmatpush.bf16.msrb.mxu3 %v1288_v37 }
  0x54   :  { %652 = vmatpush.bf16.msrb.mxu0 %v1263_v60 }
  0x55   :  { %665 = vmatpush.bf16.msrb.mxu1 %v1271_v62 }
  0x56   :  { %678 = vmatpush.bf16.msrb.mxu2 %v1279_v63 }
  0x57   :  { %795 = vmatpush.bf16.msrb.mxu3 %v1287_v43 }
  0x58   :  { %653 = vmatpush.bf16.msrb.mxu0 %v1262_v2  ;;  %v1312_v2 = vld [vmem:[#allocation7 + $0x1] ss:$0 sm:$0xff] }
  0x59   :  { %666 = vmatpush.bf16.msrb.mxu1 %v1270_v5  ;;  %v1313_v5 = vld [vmem:[#allocation7 + $0x2] ss:$0 sm:$0xff] }
  0x5a   :  { %679 = vmatpush.bf16.msrb.mxu2 %v1278_v6 }
  0x5b   :  { %654 = vmatmul.bf16.vlgmr.msrb.gmra.mxu0 %v248_v7  ;;  %796 = vmatpush.bf16.msrb.mxu3 %v1286_v48 }
  0x5c   :  { %667 = vmatmul.bf16.vlgmr.msrb.gmra.mxu1 %v249_v8 }
  0x5d   :  { %680 = vmatmul.bf16.vlgmr.msrb.gmra.mxu2 %v250_v9  ;;  %v1301_v9 = vld [vmem:[#allocation11 + $0x38] sm:$0xff] }
  0x5e   :  { %908 = vmatpush.bf16.msra.mxu0 %v1301_v9 }
  0xb8   :  { %v603_v10 = vpop.f32.mrf.mxu0 }
  0xb9   :  { %v616_v11 = vpop.f32.mrf.mxu1  ;;  %v604_v18 = vadd.f32 %v1311_v15, %v603_v10  ;;  %v1300_v10 = vld [vmem:[#allocation11 + $0x30] sm:$0xff] }
  0xba   :  { %909 = vmatpush.bf16.msra.mxu0 %v1300_v10 }
  0xbb   :  { %v617_v19 = vadd.f32 %v616_v11, %v604_v18  ;;  %v1299_v11 = vld [vmem:[#allocation11 + $0x28] sm:$0xff] }
  0xbe   :  { %910 = vmatpush.bf16.msra.mxu0 %v1299_v11 }
  0xc0   :  { %v629_v12 = vpop.f32.mrf.mxu2  ;;  %v605_v13 = vpop.f32.mrf.mxu0 }
  0xc1   :  { %v618_v14 = vpop.f32.mrf.mxu1  ;;  %v642_v16 = vpop.f32.mrf.mxu3  ;;  %v630_v22 = vadd.f32 %v629_v12, %v617_v19  ;;  %v1314_v12 = vld [vmem:[#allocation10] ss:$0 sm:$0xff]  ;;  %v1298_v13 = vld [vmem:[#allocation11 + $0x20] sm:$0xff] }
  0xc2   :  { %911 = vmatpush.bf16.msra.mxu0 %v1298_v13 }
  0xc3   :  { %v643_v24 = vadd.f32 %v642_v16, %v630_v22  ;;  %v1297_v16 = vld [vmem:[#allocation11 + $0x18] sm:$0xff] }
  0xc6   :  { %912 = vmatpush.bf16.msra.mxu0 %v1297_v16 }
  0xc8   :  { %v631_v17 = vpop.f32.mrf.mxu2 }
  0xc9   :  { %v644_v20 = vpop.f32.mrf.mxu3 }
  0xca   :  { %v1296_v20 = vld [vmem:[#allocation11 + $0x10] sm:$0xff] }
  0xcb   :  { %913 = vmatpush.bf16.msra.mxu0 %v1296_v20 }
  0xcf   :  { %914 = vmatpush.bf16.msra.mxu0 %v1295_v26 }
  0xd3   :  { %915 = vmatpush.bf16.msra.mxu0 %v1294_v29 }
  0xd8   :  { %v655_v25 = vpop.f32.mrf.mxu0 }
  0xd9   :  { %v668_v27 = vpop.f32.mrf.mxu1  ;;  %v656_v28 = vadd.f32 %v655_v25, %v643_v24 }
  0xdb   :  { %v669_v30 = vadd.f32 %v668_v27, %v656_v28 }
  0xe0   :  { %v681_v31 = vpop.f32.mrf.mxu2  ;;  %v657_v34 = vpop.f32.mrf.mxu0 }
  0xe1   :  { %v682_v33 = vadd.f32 %v681_v31, %v669_v30  ;;  %v670_v35 = vpop.f32.mrf.mxu1 }
  0xe3   :  { %v685_v36 = vmax.f32 %v682_v33, 0.0 }
  0xe5   :  { %v686_v38 = vrot.slane %v685_v36, 4  ;;  %v693_v39 = vmul.f32 %v685_v36, %v685_v36 }
  0xe7   :  { %v687_v40 = vadd.f32 %v686_v38, %v685_v36  ;;  %v694_v41 = vrot.slane %v693_v39, 4 }
  0xe8   :  { %v683_v42 = vpop.f32.mrf.mxu2 }
  0xe9   :  { %v688_v44 = vrot.slane %v687_v40, 2  ;;  %v695_v45 = vadd.f32 %v694_v41, %v693_v39 }
  0xeb   :  { %v689_v46 = vadd.f32 %v688_v44, %v687_v40  ;;  %v696_v47 = vrot.slane %v695_v45, 2 }
  0xed   :  { %v690_v49 = vrot.slane %v689_v46, 1  ;;  %v697_v50 = vadd.f32 %v696_v47, %v695_v45  ;;  %v1315_v47 = vld [vmem:[#allocation10 + $0x1] ss:$0 sm:$0xff] }
  0xef   :  { %v691_v51 = vadd.f32 %v690_v49, %v689_v46  ;;  %v698_v52 = vrot.slane %v697_v50, 1 }
  0xf1   :  { %v692_v53 = vmul.f32 0.125, %v691_v51  ;;  %v699_v54 = vadd.f32 %v698_v52, %v697_v50  ;;  %v1316_v50 = vld [vmem:[#allocation10 + $0x2] ss:$0 sm:$0xff] }
  0xf3   :  { %v700_v55 = vmul.f32 0.125, %v699_v54  ;;  %v701_v56 = vmul.f32 %v692_v53, %v692_v53  ;;  %v703_v1 = vsub.f32 %v685_v36, %v692_v53  ;;  %v1317_v54 = vld [vmem:[%s1588_s6] ss:$0 sm:$0xff] }
  0xf5   :  { %v702_v57 = vsub.f32 %v700_v55, %v701_v56 }
  0xf7   :  { %v704_v58 = vadd.f32 1e-05, %v702_v57 }
  0xf9   :  { %1318 = vrsqrt.f32 %v704_v58  ;;  %vm711_vm1 = vweird.f32 %v704_v58 }
  0xff   :  { %v1319_v59 = vpop.eup %1318 }
 0x100   :  { %v706_v60 = vmul.f32 %v1319_v59, %v704_v58  ;;  %vm712_vm0 = vweird.f32 %v1319_v59 }
 0x101   :  { %vm713_vm2 = vmor %vm711_vm1, %vm712_vm0 }
 0x102   :  { %v707_v61 = vmul.f32 %v1319_v59, %v706_v60 }
 0x104   :  { %v708_v62 = vmul.f32 0.5, %v707_v61 }
 0x106   :  { %v709_v63 = vsub.f32 1.5, %v708_v62 }
 0x108   :  { %v710_v0 = vmul.f32 %v1319_v59, %v709_v63 }
 0x10a   :  { %v714_v3 = vsel %vm713_vm2, %v1319_v59, %v710_v0 }
 0x10b   :  { %v715_v4 = vmul.f32 %v714_v3, %v703_v1 }
 0x10d   :  { %v718_v6 = vmul.f32 %v1312_v2, %v715_v4 }
 0x10f   :  { %v721_v7 = vadd.f32 %v1313_v5, %v718_v6 }
 0x111   :  { %v722_v8 = vpack.c.bf16 %v721_v7, %v721_v7 }
 0x113   :  { %797 = vmatmul.bf16.vlgmr.msrb.gmra.mxu3 %v722_v8 }
 0x196   :  { %v798_v14 = vpop.f32.mrf.mxu3 }
 0x197   :  { %v799_v15 = vadd.f32 %v1314_v12, %v798_v14 }
 0x199   :  { %v802_v17 = vmax.f32 %v799_v15, 0.0 }
 0x19b   :  { %v803_v18 = vrot.slane %v802_v17, 4  ;;  %v810_v19 = vmul.f32 %v802_v17, %v802_v17 }
 0x19d   :  { %v804_v21 = vadd.f32 %v803_v18, %v802_v17  ;;  %v811_v22 = vrot.slane %v810_v19, 4 }
 0x19e   :  { %v800_v23 = vpop.f32.mrf.mxu3 }
 0x19f   :  { %v805_v24 = vrot.slane %v804_v21, 2  ;;  %v812_v25 = vadd.f32 %v811_v22, %v810_v19 }
 0x1a1   :  { %v806_v27 = vadd.f32 %v805_v24, %v804_v21  ;;  %v813_v28 = vrot.slane %v812_v25, 2 }
 0x1a3   :  { %v807_v30 = vrot.slane %v806_v27, 1  ;;  %v814_v31 = vadd.f32 %v813_v28, %v812_v25 }
 0x1a5   :  { %v808_v32 = vadd.f32 %v807_v30, %v806_v27  ;;  %v815_v33 = vrot.slane %v814_v31, 1 }
 0x1a7   :  { %v809_v34 = vmul.f32 0.125, %v808_v32  ;;  %v816_v35 = vadd.f32 %v815_v33, %v814_v31 }
 0x1a9   :  { %v817_v36 = vmul.f32 0.125, %v816_v35  ;;  %v818_v37 = vmul.f32 %v809_v34, %v809_v34  ;;  %v820_v46 = vsub.f32 %v802_v17, %v809_v34 }
 0x1ab   :  { %v819_v38 = vsub.f32 %v817_v36, %v818_v37 }
 0x1ad   :  { %v821_v39 = vadd.f32 1e-05, %v819_v38 }
 0x1af   :  { %1320 = vrsqrt.f32 %v821_v39  ;;  %vm828_vm4 = vweird.f32 %v821_v39 }
 0x1b5   :  { %v1321_v40 = vpop.eup %1320 }
 0x1b6   :  { %v823_v41 = vmul.f32 %v1321_v40, %v821_v39  ;;  %vm829_vm3 = vweird.f32 %v1321_v40 }
 0x1b7   :  { %vm830_vm5 = vmor %vm828_vm4, %vm829_vm3 }
 0x1b8   :  { %v824_v42 = vmul.f32 %v1321_v40, %v823_v41 }
 0x1ba   :  { %v825_v43 = vmul.f32 0.5, %v824_v42 }
 0x1bc   :  { %v826_v44 = vsub.f32 1.5, %v825_v43 }
 0x1be   :  { %v827_v45 = vmul.f32 %v1321_v40, %v826_v44 }
 0x1c0   :  { %v831_v48 = vsel %vm830_vm5, %v1321_v40, %v827_v45 }
 0x1c1   :  { %v832_v49 = vmul.f32 %v831_v48, %v820_v46 }
 0x1c3   :  { %v835_v51 = vmul.f32 %v1315_v47, %v832_v49 }
 0x1c5   :  { %v838_v52 = vadd.f32 %v1316_v50, %v835_v51 }
 0x1c7   :  { %v839_v53 = vpack.c.bf16 %v838_v52, %v838_v52 }
 0x1c9   :  { %916 = vmatmul.bf16.vlgmr.msra.gmra.mxu0 %v839_v53 }
 0x246   :  { %v917_v55 = vpop.f32.mrf.mxu0 }
 0x247   :  { %v918_v56 = vadd.f32 %v1317_v54, %v917_v55 }
 0x249   :  { %921 = vst [vmem:[#allocation13] sm:$0xff] %v918_v56 }
 0x24a   :  { %932 = dma.vmem_to_hbm [thread:$0]  %s928_s30, 128, %s930_s10, [#allocation4]  }
 0x24e   :  { %v919_v57 = vpop.f32.mrf.mxu0 }
 0x24f   :  { %1498 = dma.done.wait [#allocation4], 128  }
 0x250   :  { %1499 = vsyncadd [#allocation4], 4294967168 }
 0x251   :  { %937 = vsyncpa [#allocation3], 1 }
 0x252   :  { %938 = vsyncpa [#allocation6], 1 }
 0x253   :  { %939 = vsyncpa [#allocation9], 1 }
 0x254   :  { %940 = vsyncpa [#allocation12], 1 }
 0x255   :  { %941 = vsyncpa [#allocation4], 1 }

</bundles_post_ra>
